<compile_context>
chip_gen: v5e
topology: v5e:2x2
jax: 0.10.0
libtpu: 0.0.40
codegen_flags: <defaults>
</compile_context>

<pallas_src>
import functools

import jax
import jax.numpy as jnp
from jax.experimental import pallas as pl
from jax.experimental.pallas import tpu as pltpu


# ---------------------------------------------------------------------------
# Kernel 1: encoder projection + NLReLU + time-mean (tiled reduction over time)
# ---------------------------------------------------------------------------
def scb_encoder_kernel(p_ref, wf_ref, lat_ref, *, inv_n):
    # p_ref:   (1, TN, CK)  im2col patch tile for batch element b, time tile t
    # wf_ref:  (CK, H)      windowed filter bank (resident, constant index map)
    # lat_ref: (1, 1, H)    latent accumulator (same block across the time axis)
    t = pl.program_id(1)

    @pl.when(t == 0)
    def _init():
        lat_ref[...] = jnp.zeros_like(lat_ref)

    patches = p_ref[0]                                             # (TN, CK)
    conv = jnp.dot(patches, wf_ref[...],
                   preferred_element_type=jnp.float32)             # (TN, H)
    act = jnp.log(1.0 + jnp.maximum(conv, 0.0))                    # NLReLU (beta = 1)
    lat_ref[...] += jnp.sum(act, axis=0).reshape(lat_ref.shape)

    @pl.when(t == pl.num_programs(1) - 1)
    def _finalize():
        lat_ref[...] *= inv_n                                      # time mean


# ---------------------------------------------------------------------------
# Kernel 2: whole-batch classifier in one grid step
# ---------------------------------------------------------------------------
def scb_classifier_kernel(lat_ref, g_ref, b_ref, w1_ref, a1_ref,
                          w2_ref, b2_ref, out_ref):
    x = lat_ref[...]                                               # (B, H)

    # LayerNorm(cls_dim)  (requires cls_dim == num_embeddings, as in the module)
    mu = jnp.mean(x, axis=-1, keepdims=True)
    var = jnp.mean((x - mu) ** 2, axis=-1, keepdims=True)
    x = (x - mu) * jax.lax.rsqrt(var + 1e-5) * g_ref[...] + b_ref[...]

    # Linear(H -> D, no bias) + PReLU(D)
    h1 = jnp.dot(x, w1_ref[...], preferred_element_type=jnp.float32)   # (B, D)
    h1 = jnp.where(h1 >= 0.0, h1, a1_ref[...] * h1)

    # Linear(D -> num_classes, with bias)
    out_ref[...] = (jnp.dot(h1, w2_ref[...],
                            preferred_element_type=jnp.float32)
                    + b2_ref[...])


# ---------------------------------------------------------------------------
# Parameter helpers
# ---------------------------------------------------------------------------
def make_windows(win_coef, K):
    """Generalized cosine windows: w[n] = sum_k (-1)^k a_k cos(2 pi k n / (K-1))."""
    wk = win_coef.shape[1]
    k = jnp.arange(wk, dtype=jnp.float32)
    t = jnp.arange(K, dtype=jnp.float32)
    denom = float(max(K - 1, 1))                     # guard K == 1
    cos_basis = jnp.cos(2.0 * jnp.pi * k[:, None] * t[None, :] / denom)   # (wk, K)
    sign = jnp.where(jnp.arange(wk) % 2 == 0, 1.0, -1.0).astype(jnp.float32)
    return jnp.einsum('hw,w,wk->hk', win_coef, sign, cos_basis)           # (H, K)


def _im2col(X, K, stride):
    """patches[b, n, c*K + t] = X[b, c, n*stride + t]  (valid padding)."""
    B, C, L = X.shape
    N_out = (L - K) // stride + 1
    idx = jnp.arange(N_out)[:, None] * stride + jnp.arange(K)[None, :]
    patches = X[:, :, idx]                                         # (B, C, N_out, K)
    patches = jnp.transpose(patches, (0, 2, 1, 3)).reshape(B, N_out, C * K)
    return patches, N_out


# ---------------------------------------------------------------------------
# Forward wrapper
# ---------------------------------------------------------------------------
def scb_forward(X, params, *, stride=8, time_tile=16):
    B, C, L = X.shape
    filters = params["filters"]                       # (H, C, K)
    H, _, K = filters.shape

    # Windowed filter codebook (encoder weights)
    windows = make_windows(params["win_coef"], K)     # (H, K)
    Wf = (filters * windows[:, None, :]).reshape(H, C * K).T       # (CK, H)
    CK = C * K

    # im2col (glue).  With the module's default stride=8 this inflates by K/stride only.
    patches, N_out = _im2col(X, K, stride)            # (B, N_out, CK)

    # Pad time axis to a multiple of the tile; zero rows contribute log(1+relu(0)) = 0.
    NT = pl.cdiv(N_out, time_tile)
    N_pad = NT * time_tile
    if N_pad != N_out:
        patches = jnp.pad(patches, ((0, 0), (0, N_pad - N_out), (0, 0)))

    latent = pl.pallas_call(
        functools.partial(scb_encoder_kernel, inv_n=1.0 / N_out),
        out_shape=jax.ShapeDtypeStruct((B, 1, H), jnp.float32),
        grid=(B, NT),
        in_specs=[
            pl.BlockSpec((1, time_tile, CK), lambda b, t: (b, t, 0)),
            pl.BlockSpec((CK, H), lambda b, t: (0, 0)),
        ],
        out_specs=pl.BlockSpec((1, 1, H), lambda b, t: (b, 0, 0)),
        compiler_params=pltpu.CompilerParams(
            dimension_semantics=("parallel", "arbitrary")),
    )(patches, Wf)
    latent = latent.reshape(B, H)

    # Classifier: one grid step over the whole batch (dense MXU M-dimension = B).
    D = params["w1"].shape[0]                         # cls_dim
    NC = params["w2"].shape[0]                        # num_classes
    logits = pl.pallas_call(
        scb_classifier_kernel,
        out_shape=jax.ShapeDtypeStruct((B, NC), jnp.float32),
        grid=(1,),
        in_specs=[
            pl.BlockSpec((B, H), lambda i: (0, 0)),
            pl.BlockSpec((1, H), lambda i: (0, 0)),
            pl.BlockSpec((1, H), lambda i: (0, 0)),
            pl.BlockSpec((H, D), lambda i: (0, 0)),
            pl.BlockSpec((1, D), lambda i: (0, 0)),
            pl.BlockSpec((D, NC), lambda i: (0, 0)),
            pl.BlockSpec((1, NC), lambda i: (0, 0)),
        ],
        out_specs=pl.BlockSpec((B, NC), lambda i: (0, 0)),
    )(latent,
      params["ln_gamma"].reshape(1, H),
      params["ln_beta"].reshape(1, H),
      params["w1"].T,                                 # (H, D)
      params["a1"].reshape(1, D),
      params["w2"].T,                                 # (D, NC)
      params["b2"].reshape(1, NC))
    return logits


# ---------------------------------------------------------------------------
# Pure-JAX reference (identical math, PyTorch weight layouts)
# ---------------------------------------------------------------------------
def scb_reference(X, params, *, stride=8):
    filters = params["filters"]
    H, C, K = filters.shape
    windows = make_windows(params["win_coef"], K)
    W = filters * windows[:, None, :]
    patches, N_out = _im2col(X, K, stride)
    conv = patches @ W.reshape(H, C * K).T            # (B, N_out, H)
    act = jnp.log(1.0 + jnp.maximum(conv, 0.0))       # NLReLU before the mean
    latent = act.mean(axis=1)                         # (B, H)
    mu = latent.mean(-1, keepdims=True)
    var = ((latent - mu) ** 2).mean(-1, keepdims=True)
    x = (latent - mu) / jnp.sqrt(var + 1e-5) * params["ln_gamma"] + params["ln_beta"]
    h1 = x @ params["w1"].T
    h1 = jnp.where(h1 >= 0, h1, params["a1"] * h1)
    return h1 @ params["w2"].T + params["b2"]


def init_params(key, *, in_channels, num_embeddings, embedding_dim,
                num_classes, window_k, cls_dim):
    # nn.LayerNorm(cls_dim) is applied to the (B, num_embeddings) latent, so the module
    # is only shape-valid when cls_dim == num_embeddings.
    assert cls_dim == num_embeddings
    ks = jax.random.split(key, 6)
    H, C, K, D = num_embeddings, in_channels, embedding_dim, cls_dim
    # Hamming-like base generalized-cosine coefficients + small per-filter perturbation.
    base = jnp.zeros((window_k,), jnp.float32).at[0].set(0.54).at[1].set(0.46)
    return {
        "filters": 0.1 * jax.random.normal(ks[0], (H, C, K), jnp.float32),
        "win_coef": base[None, :] + 0.01 * jax.random.normal(ks[1], (H, window_k), jnp.float32),
        "ln_gamma": jnp.ones((D,), jnp.float32),
        "ln_beta": jnp.zeros((D,), jnp.float32),
        "w1": 0.1 * jax.random.normal(ks[2], (D, H), jnp.float32),          # Linear(H->D), (out, in)
        "a1": 0.25 * jnp.ones((D,), jnp.float32),                           # PReLU(D)
        "w2": 0.1 * jax.random.normal(ks[3], (num_classes, D), jnp.float32),  # Linear(D->NC), (out, in)
        "b2": 0.01 * jax.random.normal(ks[4], (num_classes,), jnp.float32),
    }


if __name__ == "__main__":
    # Small shapes consistent with SCB.forward: X is (batch, in_channels, signal_length).
    B, C, L = 4, 1, 256
    num_embeddings = 32       # H (encoder out channels / codebook size)
    embedding_dim = 16        # K (encoder kernel size)
    cls_dim = 32              # must equal num_embeddings (see init_params)
    num_classes = 8
    window_k = 5
    stride = 8                # module default

    key = jax.random.PRNGKey(0)
    kx, kp = jax.random.split(key)
    X = jax.random.normal(kx, (B, C, L), jnp.float32)
    params = init_params(kp, in_channels=C, num_embeddings=num_embeddings,
                         embedding_dim=embedding_dim, num_classes=num_classes,
                         window_k=window_k, cls_dim=cls_dim)

    logits = scb_forward(X, params, stride=stride)
    logits = jax.block_until_ready(logits)

    ref = scb_reference(X, params, stride=stride)
    assert logits.shape == (B, num_classes)
    assert jnp.all(jnp.isfinite(logits))
    assert jnp.allclose(logits, ref, rtol=1e-3, atol=1e-3)

    print("KERNEL_OK")
</pallas_src>

<mosaic_0001>
module attributes {stable_mosaic.version = 11 : i64} {
  func.func @scb_encoder_kernel(%arg0: i32, %arg1: i32, %arg2: memref<1x16x16xf32, #tpu.memory_space<vmem>>, %arg3: memref<16x32xf32, #tpu.memory_space<vmem>>, %arg4: memref<1x1x32xf32, #tpu.memory_space<vmem>>) attributes {dimension_semantics = [#tpu.dimension_semantics<parallel>, #tpu.dimension_semantics<arbitrary>], iteration_bounds = array<i64: 4, 2>, scalar_prefetch = 0 : i64, scratch_operands = 0 : i64, tpu.core_type = #tpu.core_type<tc>, window_params = [{transform_indices = @transform_0, window_bounds = array<i64: 1, 16, 16>}, {pipeline_mode = #tpu.pipeline_mode<synchronous>, transform_indices = @transform_1, window_bounds = array<i64: 16, 32>}, {transform_indices = @transform_2, window_bounds = array<i64: 1, 1, 32>}]} {
    %c0_i32 = arith.constant 0 : i32
    %0 = arith.cmpi eq, %arg1, %c0_i32 : i32
    %1 = arith.extui %0 : i1 to i32
    %c0_i32_0 = arith.constant 0 : i32
    %2 = arith.cmpi ne, %1, %c0_i32_0 : i32
    scf.if %2 {
      %cst_15 = arith.constant 0.000000e+00 : f32
      %20 = vector.broadcast %cst_15 : f32 to vector<1x1x32xf32>
      %c0_16 = arith.constant 0 : index
      %c0_17 = arith.constant 0 : index
      %c0_18 = arith.constant 0 : index
      %21 = vector.load %arg4[%c0_16, %c0_17, %c0_18] : memref<1x1x32xf32, #tpu.memory_space<vmem>>, vector<1x1x32xf32>
      tpu.vector_store %arg4[%c0_16, %c0_17, %c0_18], %20 {strides = array<i32>} : memref<1x1x32xf32, #tpu.memory_space<vmem>>, vector<1x1x32xf32>,
    } else {
    }
    %c0 = arith.constant 0 : index
    %c0_1 = arith.constant 0 : index
    %c0_2 = arith.constant 0 : index
    %3 = vector.load %arg2[%c0, %c0_1, %c0_2] : memref<1x16x16xf32, #tpu.memory_space<vmem>>, vector<1x16x16xf32>
    %4 = vector.shape_cast %3 : vector<1x16x16xf32> to vector<16x16xf32>
    %c0_3 = arith.constant 0 : index
    %c0_4 = arith.constant 0 : index
    %5 = vector.load %arg3[%c0_3, %c0_4] : memref<16x32xf32, #tpu.memory_space<vmem>>, vector<16x32xf32>
    %cst = arith.constant dense<0.000000e+00> : vector<16x32xf32>
    %6 = tpu.matmul %4, %5, %cst {dimension_numbers = #tpu.dot_dimension_numbers<[1], [0], [0], [1], [0, 0, 1, 1], [], []>} : vector<16x16xf32>, vector<16x32xf32>, vector<16x32xf32> -> vector<16x32xf32>
    %cst_5 = arith.constant 0.000000e+00 : f32
    %7 = vector.broadcast %cst_5 : f32 to vector<16x32xf32>
    %8 = arith.maximumf %6, %7 : vector<16x32xf32>
    %cst_6 = arith.constant 1.000000e+00 : f32
    %9 = vector.broadcast %cst_6 : f32 to vector<16x32xf32>
    %10 = arith.addf %9, %8 : vector<16x32xf32>
    %11 = math.log %10 : vector<16x32xf32>
    %c0_7 = arith.constant 0 : index
    %c0_8 = arith.constant 0 : index
    %c0_9 = arith.constant 0 : index
    %12 = vector.load %arg4[%c0_7, %c0_8, %c0_9] : memref<1x1x32xf32, #tpu.memory_space<vmem>>, vector<1x1x32xf32>
    %cst_10 = arith.constant dense<0.000000e+00> : vector<32xf32>
    %13 = vector.multi_reduction <add>, %11, %cst_10 [0] : vector<16x32xf32> to vector<32xf32>
    %14 = vector.shape_cast %13 : vector<32xf32> to vector<1x1x32xf32>
    %15 = arith.addf %12, %14 : vector<1x1x32xf32>
    %c0_11 = arith.constant 0 : index
    %c0_12 = arith.constant 0 : index
    %c0_13 = arith.constant 0 : index
    %16 = vector.load %arg4[%c0_11, %c0_12, %c0_13] : memref<1x1x32xf32, #tpu.memory_space<vmem>>, vector<1x1x32xf32>
    tpu.vector_store %arg4[%c0_11, %c0_12, %c0_13], %15 {strides = array<i32>} : memref<1x1x32xf32, #tpu.memory_space<vmem>>, vector<1x1x32xf32>,
    %c1_i32 = arith.constant 1 : i32
    %17 = arith.cmpi eq, %arg1, %c1_i32 : i32
    %18 = arith.extui %17 : i1 to i32
    %c0_i32_14 = arith.constant 0 : i32
    %19 = arith.cmpi ne, %18, %c0_i32_14 : i32
    scf.if %19 {
      %c0_15 = arith.constant 0 : index
      %c0_16 = arith.constant 0 : index
      %c0_17 = arith.constant 0 : index
      %20 = vector.load %arg4[%c0_15, %c0_16, %c0_17] : memref<1x1x32xf32, #tpu.memory_space<vmem>>, vector<1x1x32xf32>
      %cst_18 = arith.constant 0.0322580636 : f32
      %21 = vector.broadcast %cst_18 : f32 to vector<1x1x32xf32>
      %22 = arith.mulf %20, %21 : vector<1x1x32xf32>
      %c0_19 = arith.constant 0 : index
      %c0_20 = arith.constant 0 : index
      %c0_21 = arith.constant 0 : index
      %23 = vector.load %arg4[%c0_19, %c0_20, %c0_21] : memref<1x1x32xf32, #tpu.memory_space<vmem>>, vector<1x1x32xf32>
      tpu.vector_store %arg4[%c0_19, %c0_20, %c0_21], %22 {strides = array<i32>} : memref<1x1x32xf32, #tpu.memory_space<vmem>>, vector<1x1x32xf32>,
    } else {
    }
    return
  }
  func.func @transform_0(%arg0: i32, %arg1: i32) -> (i32, i32, i32) {
    %c0_i32 = arith.constant 0 : i32
    %c0_i32_0 = arith.constant 0 : i32
    return %arg0, %arg1, %c0_i32 : i32, i32, i32
  }
  func.func @transform_1(%arg0: i32, %arg1: i32) -> (i32, i32) {
    %c0_i32 = arith.constant 0 : i32
    %c0_i32_0 = arith.constant 0 : i32
    %c0_i32_1 = arith.constant 0 : i32
    return %c0_i32, %c0_i32_0 : i32, i32
  }
  func.func @transform_2(%arg0: i32, %arg1: i32) -> (i32, i32, i32) {
    %c0_i32 = arith.constant 0 : i32
    %c0_i32_0 = arith.constant 0 : i32
    %c0_i32_1 = arith.constant 0 : i32
    return %arg0, %c0_i32, %c0_i32_0 : i32, i32, i32
  }
}

</mosaic_0001>

<bundles_post_ra>
// kernel: tpu_custom_call.1
= control target key start
LH: loop header
LB: loop body
LE: loop exit
PB: predicated region body
PF: predicated region fallthrough
CT: control target
= control target key end

     0   :  { %7 = vsyncpa [#allocation3], 0  ;;  %s665_s0 = inlined_call_operand.vmem [shape: f32[4,32,16], index: 0, kind: input, shape index: {}]   ;;  %s666_s1 = inlined_call_operand.vmem [shape: f32[16,32], index: 1, kind: input, shape index: {}]   ;;  %s667_s2 = inlined_call_operand.hbm [shape: f32[4,1,32], index: 2, kind: output, shape index: {}]  }
   0x1   :  { %9 = vsyncpa [#allocation3 + $0x1], 0  ;;  %s527_s9 = smov 0   ;;  %s529_s10 = smov 0  }
   0x2   :  { %s531_s11 = smov 0   ;;  %s533_s12 = smov 0  }
   0x3   :  { %s535_s13 = smov 0   ;;  %s537_s14 = smov 0  }
   0x4   :  { %s539_s15 = smov 0   ;;  %s541_s16 = smov 0  }
   0x5 LB: > { %s323_s17 = sadd.s32 4294967295, %s509_s16   ;;  %s324_s18 = sadd.s32 4294967294, %s509_s16   ;;  %s509_s16 = sphi %s541_s16, %s15_s16   ;;  %s505_s15 = sphi %s539_s15, %s676_s15   ;;  %s501_s14 = sphi %s537_s14, %s675_s14   ;;  %s497_s13 = sphi %s535_s13, %s674_s13   ;;  %s493_s12 = sphi %s533_s12, %s673_s12   ;;  %s489_s11 = sphi %s531_s11, %s672_s11   ;;  %s485_s10 = sphi %s529_s10, %s671_s10   ;;  %s481_s9 = sphi %s527_s9, %s670_s9  }
   0x6   : > { %s24_s19 = sadd.s32 1, %s501_s14  ;;  %s27_s20 = sadd.s32 1, %s505_s15 }
   0x7   : > { %p25_p0 = scmp.ge.s32.totalorder %s24_s19, 2  ;;  %p93_p1 = scmp.ne.s32.totalorder %s489_s11, %s485_s10 }
   0x8   : > { %p94_p2 = scmp.eq.s32.totalorder %s323_s17, 7  ;;  %p99_p4 = scmp.ne.s32.totalorder %s485_s10, %s481_s9 }
   0x9   : > { %s678_s19 = smov (%p25_p0, %s24_s19), 0  ;;  %s680_s20 = smov (!%p25_p0, %s27_s20), %s505_s15 }
   0xa   : > { %p576_p3 = por %p94_p2, %p93_p1  ;;  %p29_p5 = scmp.ge.s32.totalorder %s680_s20, 4 }
   0xb   : > { %p100_p6 = scmp.eq.s32.totalorder %s324_s18, 7  ;;  %p327_p7 = scmp.ge.s32.totalorder %s509_s16, 1 }
   0xc   : > { %p134_p8 = scmp.lt.s32.totalorder %s509_s16, 9  ;;  %s682_s20 = smov (%p29_p5, %s680_s20), 0 }
   0xd   : > { %p586_p9 = por %p100_p6, %p99_p4  ;;  %s80_s23 = ssub.s32 %s505_s15, %s682_s20 }
   0xe   : > { %p135_p10 = pnand %p327_p7, %p134_p8  ;;  %s83_s24 = sadd.s32 1, %s489_s11 }
   0xf   : > { %p81_p11 = scmp.eq.s32.totalorder %s80_s23, 0  ;;  %s157_s26 = sand.u32 (!%p135_p10), 1, %s485_s10  }
  0x10   : > { %138 = sbr.rel (%p135_p10) target bundleno = 215 (0xd7), region = 28  ;;  %s328_s27 = sshll.u32 (!%p135_p10), %s493_s12, 1 }
  0x11   : > { %s594_s25 = scalar_select %p81_p11, %s489_s11, %s83_s24  }
  0x12   : > { %p160_p12 = scmp.lt.s32.totalorder (!%p135_p10), %s497_s13, 3  ;;  %p162_p13 = scmp.lt.s32.totalorder (!%p135_p10), %s328_s27, 3 }
  0x13   : > { %s605_s7 = scalar_lea.vmem (!%p135_p10), [#allocation2], %s157_s26  ;;  %p331_p0 = scmp.ne.s32.totalorder (!%p135_p10), %s493_s12, 0 }
  0x15   : > { %s161_s28 = scalar_select %p160_p12, %s497_s13, 3 }
  0x16   : > { %s684_s27 = smov (!%p162_p13, %s328_s27), 3  ;;  %172 = sbr.rel (%p331_p0) target bundleno = 29 (0x1d), region = 32 }
  0x17   : > { %s329_s29 = sshll.u32 %s161_s28, 2 }
  0x18   : > { %s165_s30 = sadd.s32 %s329_s29, %s684_s27 }
  0x19   : > { %s330_s3 = sshll.u32 %s165_s30, 3 }
  0x1a   : > { %s167_s6 = scalar_lea.vmem %s665_s0, %s330_s3 }
  0x1b   : > { %vm173_vm0 = vcmask 253952   ;;  %v511_v0 = vmov 0.0  }
  0x1c   : > { %174 = vst.msk [vmem:[%s605_s7] sm:$0x1] %vm173_vm0, %v511_v0 }
  0x1d PF: > { %v178_v1 = vld [vmem:[%s666_s1 + $0x8] sm:$0xff]  ;;  %v177_v2 = vld [vmem:[%s666_s1] sm:$0xff]  ;;  %vm179_vm1 = vcmask 130048   ;;  %vm218_vm2 = vcmask 261120   ;;  %vm229_vm3 = vcmask 253952   ;;  %p334_p1 = scmp.ne.s32.totalorder %s493_s12, 1 }
  0x1e   : > { %200 = vmatpush.msra.mxu0 %v178_v1  ;;  %337 = vmatpush.msra.mxu1 %v178_v1  ;;  %v175_v3 = vld [vmem:[%s167_s6] sm:$0xff]  ;;  %v176_v4 = vld [vmem:[%s167_s6 + $0x8] sm:$0xff] }
  0x20   : > { %201 = vmatpush.msra.mxu0 %v177_v2  ;;  %338 = vmatpush.msra.mxu1 %v177_v2 }
  0x21   : > { %332 = vmatmul.msk.f32.vlgmr.msra.gmra.mxu0 %vm179_vm1, %v175_v3  ;;  %333 = vmatmul.msk.f32.vlgmr.msra.gmra.mxu1 %vm179_vm1, %v176_v4 }
  0x23   : > { %v217_v23 = vld [vmem:[%s605_s7] sm:$0x1] }
  0x9e   : > { %v203_v5 = vpop.f32.mrf.mxu0  ;;  %v206_v6 = vpop.f32.mrf.mxu1 }
  0x9f   : > { %v209_v7 = vmax.f32 %v203_v5, 0.0  ;;  %v210_v8 = vmax.f32 %v206_v6, 0.0 }
  0xa1   : > { %v211_v9 = vadd.f32 1.0, %v209_v7  ;;  %v212_v10 = vadd.f32 1.0, %v210_v8 }
  0xa3   : > { %411 = vlog2.f32 %v211_v9 }
  0xa4   : > { %413 = vlog2.f32 %v212_v10 }
  0xa9   : > { %v412_v11 = vpop.eup %411 }
  0xaa   : > { %v414_v12 = vpop.eup %413  ;;  %v214_v13 = vmul.f32 0.6931472, %v412_v11 }
  0xab   : > { %v216_v14 = vmul.f32 0.6931472, %v414_v12 }
  0xac   : > { %v219_v15 = vsel %vm218_vm2, %v214_v13, 0.0 }
  0xad   : > { %v220_v16 = vsel %vm218_vm2, %v216_v14, 0.0 }
  0xae   : > { %v221_v17 = vadd.f32 %v220_v16, %v219_v15 }
  0xb0   : > { %v222_v18 = vrot.slane %v221_v17, 4 }
  0xb2   : > { %v223_v19 = vadd.f32 %v222_v18, %v221_v17 }
  0xb4   : > { %v224_v20 = vrot.slane %v223_v19, 2 }
  0xb6   : > { %v225_v21 = vadd.f32 %v224_v20, %v223_v19 }
  0xb8   : > { %v226_v22 = vrot.slane %v225_v21, 1 }
  0xba   : > { %v227_v24 = vadd.f32 %v226_v22, %v225_v21  ;;  %234 = sbr.rel (%p334_p1) target bundleno = 201 (0xc9), region = 36 }
  0xbc   : > { %v228_v25 = vadd.f32 %v227_v24, %v217_v23 }
  0xbe   : > { %230 = vst.msk [vmem:[%s605_s7] sm:$0x1] %vm229_vm3, %v228_v25 }
  0xc5   : > { %v235_v26 = vld [vmem:[%s605_s7] sm:$0x1] }
  0xc6   : > { %v236_v27 = vmul.f32 0.032258064, %v235_v26 }
  0xc8   : > { %237 = vst.msk [vmem:[%s605_s7] sm:$0x1] %vm229_vm3, %v236_v27 }
  0xc9 PF: > { %s247_s28 = scalar_lea.hbm %s667_s2, %s497_s13  ;;  %s249_s29 = sshll.u32 %s605_s7, 4  ;;  %s250_s29 = int_to_ptr.vmem [resolvable:$true] %s249_s29 }
  0xca   : > { %s251_s30 = sshll.u32 %s247_s28, 4  ;;  %s239_s12 = scalar_lea.sflag [#allocation3], %s157_s26  ;;  %s252_s30 = int_to_ptr.hbm [resolvable:$true] %s251_s30 }
  0xcb   : > { %s429_s3 = sshra.s32 %s252_s30, 4  ;;  %s435_s8 = scalar_lea.hbm %s667_s2, 4  ;;  %s430_s3 = int_to_ptr.hbm [resolvable:$true] %s429_s3 }
  0xcc   : > { %s431_s4 = scalar_lea.hbm %s430_s3, 1  ;;  %p436_p6 = scmp.lt.s32.totalorder %s430_s3, %s667_s2 }
  0xcd   : > { %p432_p2 = scmp.ne.s32.totalorder %s430_s3, %s431_s4  ;;  %p437_p7 = scmp.lt.s32.totalorder %s435_s8, %s431_s4 }
  0xcf   : > { %p433_p4 = pnand %p432_p2, %p576_p3  ;;  %p438_p8 = por %p437_p7, %p436_p6 }
  0xd1   : > { %p434_p5 = pneg %p433_p4 }
  0xd3   : > { %p439_p10 = pnand %p438_p8, %p434_p5 }
  0xd5   : > { %442 = shalt.err (!%p439_p10)
}
  0xd6   : > { %339 = dma.vmem_to_hbm [thread:$0]  (%p576_p3), %s250_s29, 16, %s252_s30, %s239_s12  }
  0xd7 PF: > { %p345_p11 = scmp.ge.s32.totalorder %s509_s16, 2  ;;  %s263_s13 = sand.u32 1, %s481_s9  }
  0xd8   : > { %s264_s26 = scalar_lea.sflag [#allocation3], %s263_s13 }
  0xd9   : > { %p342_p12 = pnand %p345_p11, %p586_p9 }
  0xdb   : > { %p343_p13 = pneg %p342_p12 }
  0xdd   : > { %476 = dma.done.wait (%p343_p13), %s264_s26, 16  }
  0xde   : > { %478 = vsyncadd (%p343_p13), %s264_s26, 4294967280  ;;  %s15_s16 = sadd.s32 1, %s509_s16   ;;  %s670_s9 = smov %s485_s10 }
  0xdf   : > { %p12_p0 = scmp.ge.s32.totalorder %s15_s16, 10   ;;  %s671_s10 = smov %s489_s11 }
  0xe0   : > { %s672_s11 = smov %s594_s25  ;;  %s673_s12 = smov %s501_s14 }
  0xe1   : > { %s674_s13 = smov %s505_s15  ;;  %s675_s14 = smov %s678_s19 }
  0xe2   : > { %s676_s15 = smov %s682_s20  ;;  %14 = sbr.rel (!%p12_p0) target bundleno = 5 (0x5), region = 71 }
  0xe7   :  { %269 = vsyncpa [#allocation3], 1 }
  0xe8   :  { %271 = vsyncpa [#allocation3 + $0x1], 1 }

</bundles_post_ra>
